<compile_context>
chip_gen: v5e
topology: v5e:2x2
jax: 0.10.0
libtpu: 0.0.40
codegen_flags: <defaults>
</compile_context>

<pallas_src>
from typing import NamedTuple

import jax
import jax.numpy as jnp
from jax.experimental import pallas as pl
from jax.experimental.pallas import tpu as pltpu


LANE = 128  # TPU lane width (last-dim alignment target)


def _round_up(n, m):
    return ((n + m - 1) // m) * m


def _pad2(a, rows, cols, dtype):
    a = a.astype(dtype)
    pr, pc = rows - a.shape[0], cols - a.shape[1]
    if pr or pc:
        a = jnp.pad(a, ((0, pr), (0, pc)))
    return a


# --------------------------------------------------------------------------- #
# Kernel body: two MXU matmuls + bias + ReLU, fused in VMEM.
# --------------------------------------------------------------------------- #
def phi_kernel(x_ref, w1_ref, b1_ref, w2_ref, b2_ref, o_ref):
    # Biases are (1, N) f32 and broadcast against (block_b, N) f32 accumulators.
    x = x_ref[...]
    h = jnp.dot(x, w1_ref[...], preferred_element_type=jnp.float32) + b1_ref[...]
    h = jnp.maximum(h, 0.0)                                   # ReLU
    y = jnp.dot(h.astype(w2_ref.dtype), w2_ref[...],
                preferred_element_type=jnp.float32) + b2_ref[...]
    o_ref[...] = y.astype(o_ref.dtype)


# --------------------------------------------------------------------------- #
# One-time parameter preparation (hoisted out of the per-call hot path).
# --------------------------------------------------------------------------- #
class PhiParams(NamedTuple):
    w1: jax.Array          # [in_p,  hid_p]  compute dtype
    b1: jax.Array          # [1,     hid_p]  f32
    w2: jax.Array          # [hid_p, out_p]  compute dtype
    b2: jax.Array          # [1,     out_p]  f32
    input_dim: int
    hidden_dim: int
    output_dim: int


def prepare_phi_params(w1, b1, w2, b2, *, compute_dtype=None):
    """Pad/cast Phi weights ONCE (call outside the per-step hot path).

    w1: [input_dim, hidden_dim]; w2: [hidden_dim, output_dim];
    b1/b2: [N] or [1, N].  compute_dtype is the MXU dtype for x/W1/W2
    (bf16 recommended); accumulation is always f32 and biases stay f32.
    """
    if b1.ndim == 1:
        b1 = b1[None, :]
    if b2.ndim == 1:
        b2 = b2[None, :]
    in_dim, hid = w1.shape
    out_dim = w2.shape[1]
    cdt = jnp.dtype(w1.dtype if compute_dtype is None else compute_dtype)
    in_p, hid_p, out_p = (_round_up(d, LANE) for d in (in_dim, hid, out_dim))
    return PhiParams(
        w1=_pad2(w1, in_p, hid_p, cdt),
        b1=_pad2(b1, 1, hid_p, jnp.float32),
        w2=_pad2(w2, hid_p, out_p, cdt),
        b2=_pad2(b2, 1, out_p, jnp.float32),
        input_dim=in_dim, hidden_dim=hid, output_dim=out_dim)


# --------------------------------------------------------------------------- #
# Generation-aware hardware hints.
# --------------------------------------------------------------------------- #
def _tpu_hints():
    """Returns (vmem_capacity_bytes, tensorcores_per_chip) with safe fallbacks."""
    vmem_cap = 128 << 20
    try:
        vmem_cap = int(pltpu.get_tpu_info().vmem_capacity_bytes)
    except Exception:
        pass
    n_tc = 1
    try:
        kind = jax.devices()[0].device_kind.lower()
        if "v7" in kind or "7x" in kind:
            n_tc = 2
    except Exception:
        pass
    if vmem_cap <= (64 << 20):   # v7x-class: 64 MiB per TC, 2 TCs per chip
        n_tc = max(n_tc, 2)
    return vmem_cap, n_tc


# --------------------------------------------------------------------------- #
# Forward pass.
# --------------------------------------------------------------------------- #
def phi_forward(x, params: PhiParams, *, block_b=None, out_dtype=None,
                num_layers=2, dropout=None):
    """x: [B, input_dim] -> [B, output_dim] using prepared (padded) params."""
    if num_layers > 2 or dropout is not None:
        raise NotImplementedError(
            "Pallas Phi kernel implements the default config only "
            "(num_layers=2, dropout=None).")

    B, in_dim = x.shape
    assert in_dim == params.input_dim, "input feature dim mismatch"
    in_p, hid_p = params.w1.shape
    out_p = params.w2.shape[1]
    cdt = jnp.dtype(params.w1.dtype)
    out_dtype = jnp.dtype(x.dtype if out_dtype is None else out_dtype)
    out_itemsize = out_dtype.itemsize

    # --- generation-aware batch tiling --------------------------------------
    vmem_cap, n_tc = _tpu_hints()
    budget = max(vmem_cap - (12 << 20), 24 << 20)     # leave Mosaic headroom
    row_align = max(8, 32 // cdt.itemsize)            # f32 -> 8 rows, bf16 -> 16
    if block_b is None:
        block_b = 512 if vmem_cap > (64 << 20) else 256   # big tiles on v5e/v6e
    block_b = max(row_align, min(_round_up(block_b, row_align),
                                 _round_up(B, row_align)))
    # v7x: ensure >= 2 grid steps so dimension_semantics=("parallel",) can
    # shard the batch across both TensorCores.
    if (n_tc >= 2 and _round_up(B, block_b) // block_b < 2
            and block_b >= 2 * row_align):
        block_b = max(row_align, _round_up((B + 1) // 2, row_align))

    w_bytes = sum(int(a.size) * a.dtype.itemsize
                  for a in (params.w1, params.b1, params.w2, params.b2))

    def _needed(bb):
        return (2 * bb * in_p * cdt.itemsize        # x tiles (double buffered)
                + w_bytes                           # weights resident once (Buffered(1))
                + 2 * bb * out_p * out_itemsize     # out tiles (double buffered)
                + bb * hid_p * 4)                   # f32 hidden activations

    while _needed(block_b) > budget and block_b > row_align:
        block_b = max(row_align, _round_up(block_b // 2, row_align))

    B_p = _round_up(B, block_b)
    grid = (B_p // block_b,)
    vmem_limit = int(min(max(_needed(block_b) + (8 << 20), 16 << 20), budget))

    # Only the activations are padded per call; weights were prepared once.
    x_p = _pad2(x, B_p, in_p, cdt)

    cost = pl.CostEstimate(
        flops=2 * B_p * (in_p * hid_p + hid_p * out_p),
        transcendentals=0,
        bytes_accessed=int(int(x_p.size) * cdt.itemsize + w_bytes
                           + B_p * out_p * out_itemsize))

    def _const_spec(shape, buffered):
        # Constant index_map -> block never changes; single-buffer it.
        if buffered:
            return pl.BlockSpec(shape, lambda i: (0, 0),
                                pipeline_mode=pl.Buffered(1))
        return pl.BlockSpec(shape, lambda i: (0, 0))

    def _run(buffered):
        return pl.pallas_call(
            phi_kernel,
            out_shape=jax.ShapeDtypeStruct((B_p, out_p), out_dtype),
            grid=grid,
            in_specs=[
                pl.BlockSpec((block_b, in_p), lambda i: (i, 0)),   # x tile
                _const_spec((in_p, hid_p), buffered),              # W1 (resident)
                _const_spec((1, hid_p), buffered),                 # b1
                _const_spec((hid_p, out_p), buffered),             # W2 (resident)
                _const_spec((1, out_p), buffered),                 # b2
            ],
            out_specs=pl.BlockSpec((block_b, out_p), lambda i: (i, 0)),
            compiler_params=pltpu.CompilerParams(
                dimension_semantics=("parallel",),   # batch axis -> megacore shard
                vmem_limit_bytes=vmem_limit),
            cost_estimate=cost,
        )(x_p, params.w1, params.b1, params.w2, params.b2)

    try:
        y_p = _run(True)
    except Exception:   # fallback if Buffered(1) is unsupported by this jax build
        y_p = _run(False)

    # Strip batch / lane padding.
    return y_p[:B, :params.output_dim]


# --------------------------------------------------------------------------- #
# Synthetic init + self-test.
# --------------------------------------------------------------------------- #
def init_phi_params(key, input_dim, hidden_dim, output_dim, dtype=jnp.float32):
    """Deterministic synthetic init (PyTorch Linear math, weights pre-transposed)."""
    k1, k2, k3, k4 = jax.random.split(key, 4)
    w1 = jax.random.normal(k1, (input_dim, hidden_dim), dtype) * 0.1
    b1 = jax.random.normal(k2, (hidden_dim,), dtype) * 0.1
    w2 = jax.random.normal(k3, (hidden_dim, output_dim), dtype) * 0.1
    b2 = jax.random.normal(k4, (output_dim,), dtype) * 0.1
    return w1, b1, w2, b2


if __name__ == "__main__":
    key = jax.random.PRNGKey(0)
    kx, kp = jax.random.split(key)

    batch, input_dim, hidden_dim, output_dim = 16, 16, 32, 8
    x = jax.random.normal(kx, (batch, input_dim), jnp.float32)
    w1, b1, w2, b2 = init_phi_params(kp, input_dim, hidden_dim, output_dim)

    # Reference in plain JAX (same math as the PyTorch forward).
    ref = jnp.maximum(x @ w1 + b1, 0.0) @ w2 + b2

    # Weights are padded / cast ONCE, outside the per-call hot path.
    params_f32 = prepare_phi_params(w1, b1, w2, b2)
    params_bf16 = prepare_phi_params(w1, b1, w2, b2, compute_dtype=jnp.bfloat16)

    # 1) f32 path, tight tolerance.
    y = jax.block_until_ready(phi_forward(x, params_f32))
    assert y.shape == (batch, output_dim)
    assert jnp.allclose(y, ref, atol=1e-5, rtol=1e-5)

    # 2) ragged batch (exercises wrapper-side row padding, no block_b assert).
    xr = x[:13]
    yr = jax.block_until_ready(phi_forward(xr, params_f32))
    assert yr.shape == (13, output_dim)
    assert jnp.allclose(yr, ref[:13], atol=1e-5, rtol=1e-5)

    # 3) bf16 MXU fast path (f32 accumulation), loose tolerance vs f32 reference.
    yb = jax.block_until_ready(phi_forward(x, params_bf16))
    assert yb.shape == (batch, output_dim)
    assert jnp.allclose(yb, ref, atol=5e-2, rtol=5e-2)

    print("KERNEL_OK")
</pallas_src>

<mosaic_0001>
module attributes {stable_mosaic.version = 11 : i64} {
  func.func @phi_kernel(%arg0: i32, %arg1: memref<16x128xf32, #tpu.memory_space<vmem>>, %arg2: memref<128x128xf32, #tpu.memory_space<vmem>>, %arg3: memref<1x128xf32, #tpu.memory_space<vmem>>, %arg4: memref<128x128xf32, #tpu.memory_space<vmem>>, %arg5: memref<1x128xf32, #tpu.memory_space<vmem>>, %arg6: memref<16x128xf32, #tpu.memory_space<vmem>>) attributes {dimension_semantics = [#tpu.dimension_semantics<parallel>], iteration_bounds = array<i64: 1>, scalar_prefetch = 0 : i64, scratch_operands = 0 : i64, tpu.core_type = #tpu.core_type<tc>, window_params = [{transform_indices = @transform_0, window_bounds = array<i64: 16, 128>}, {pipeline_mode = #tpu.pipeline_mode<synchronous>, transform_indices = @transform_1, window_bounds = array<i64: 128, 128>}, {pipeline_mode = #tpu.pipeline_mode<synchronous>, transform_indices = @transform_2, window_bounds = array<i64: 1, 128>}, {pipeline_mode = #tpu.pipeline_mode<synchronous>, transform_indices = @transform_3, window_bounds = array<i64: 128, 128>}, {pipeline_mode = #tpu.pipeline_mode<synchronous>, transform_indices = @transform_4, window_bounds = array<i64: 1, 128>}, {transform_indices = @transform_5, window_bounds = array<i64: 16, 128>}]} {
    %c0 = arith.constant 0 : index
    %c0_0 = arith.constant 0 : index
    %0 = vector.load %arg1[%c0, %c0_0] : memref<16x128xf32, #tpu.memory_space<vmem>>, vector<16x128xf32>
    %c0_1 = arith.constant 0 : index
    %c0_2 = arith.constant 0 : index
    %1 = vector.load %arg2[%c0_1, %c0_2] : memref<128x128xf32, #tpu.memory_space<vmem>>, vector<128x128xf32>
    %cst = arith.constant dense<0.000000e+00> : vector<16x128xf32>
    %2 = tpu.matmul %0, %1, %cst {dimension_numbers = #tpu.dot_dimension_numbers<[1], [0], [0], [1], [0, 0, 1, 1], [], []>} : vector<16x128xf32>, vector<128x128xf32>, vector<16x128xf32> -> vector<16x128xf32>
    %c0_3 = arith.constant 0 : index
    %c0_4 = arith.constant 0 : index
    %3 = vector.load %arg3[%c0_3, %c0_4] : memref<1x128xf32, #tpu.memory_space<vmem>>, vector<1x128xf32>
    %4 = vector.broadcast %3 : vector<1x128xf32> to vector<16x128xf32>
    %5 = arith.addf %2, %4 : vector<16x128xf32>
    %cst_5 = arith.constant 0.000000e+00 : f32
    %6 = vector.broadcast %cst_5 : f32 to vector<16x128xf32>
    %7 = arith.maximumf %5, %6 : vector<16x128xf32>
    %c0_6 = arith.constant 0 : index
    %c0_7 = arith.constant 0 : index
    %8 = vector.load %arg4[%c0_6, %c0_7] : memref<128x128xf32, #tpu.memory_space<vmem>>, vector<128x128xf32>
    %cst_8 = arith.constant dense<0.000000e+00> : vector<16x128xf32>
    %9 = tpu.matmul %7, %8, %cst_8 {dimension_numbers = #tpu.dot_dimension_numbers<[1], [0], [0], [1], [0, 0, 1, 1], [], []>} : vector<16x128xf32>, vector<128x128xf32>, vector<16x128xf32> -> vector<16x128xf32>
    %c0_9 = arith.constant 0 : index
    %c0_10 = arith.constant 0 : index
    %10 = vector.load %arg5[%c0_9, %c0_10] : memref<1x128xf32, #tpu.memory_space<vmem>>, vector<1x128xf32>
    %11 = vector.broadcast %10 : vector<1x128xf32> to vector<16x128xf32>
    %12 = arith.addf %9, %11 : vector<16x128xf32>
    %c0_11 = arith.constant 0 : index
    %c0_12 = arith.constant 0 : index
    %13 = vector.load %arg6[%c0_11, %c0_12] : memref<16x128xf32, #tpu.memory_space<vmem>>, vector<16x128xf32>
    tpu.vector_store %arg6[%c0_11, %c0_12], %12 {strides = array<i32>} : memref<16x128xf32, #tpu.memory_space<vmem>>, vector<16x128xf32>,
    return
  }
  func.func @transform_0(%arg0: i32) -> (i32, i32) {
    %c0_i32 = arith.constant 0 : i32
    %c0_i32_0 = arith.constant 0 : i32
    return %arg0, %c0_i32 : i32, i32
  }
  func.func @transform_1(%arg0: i32) -> (i32, i32) {
    %c0_i32 = arith.constant 0 : i32
    %c0_i32_0 = arith.constant 0 : i32
    %c0_i32_1 = arith.constant 0 : i32
    return %c0_i32, %c0_i32_0 : i32, i32
  }
  func.func @transform_2(%arg0: i32) -> (i32, i32) {
    %c0_i32 = arith.constant 0 : i32
    %c0_i32_0 = arith.constant 0 : i32
    %c0_i32_1 = arith.constant 0 : i32
    return %c0_i32, %c0_i32_0 : i32, i32
  }
  func.func @transform_3(%arg0: i32) -> (i32, i32) {
    %c0_i32 = arith.constant 0 : i32
    %c0_i32_0 = arith.constant 0 : i32
    %c0_i32_1 = arith.constant 0 : i32
    return %c0_i32, %c0_i32_0 : i32, i32
  }
  func.func @transform_4(%arg0: i32) -> (i32, i32) {
    %c0_i32 = arith.constant 0 : i32
    %c0_i32_0 = arith.constant 0 : i32
    %c0_i32_1 = arith.constant 0 : i32
    return %c0_i32, %c0_i32_0 : i32, i32
  }
  func.func @transform_5(%arg0: i32) -> (i32, i32) {
    %c0_i32 = arith.constant 0 : i32
    %c0_i32_0 = arith.constant 0 : i32
    return %arg0, %c0_i32 : i32, i32
  }
}

module attributes {stable_mosaic.version = 11 : i64} {
  func.func @phi_kernel(%arg0: i32, %arg1: memref<16x128xf32, #tpu.memory_space<vmem>>, %arg2: memref<128x128xf32, #tpu.memory_space<vmem>>, %arg3: memref<1x128xf32, #tpu.memory_space<vmem>>, %arg4: memref<128x128xf32, #tpu.memory_space<vmem>>, %arg5: memref<1x128xf32, #tpu.memory_space<vmem>>, %arg6: memref<16x128xf32, #tpu.memory_space<vmem>>) attributes {dimension_semantics = [#tpu.dimension_semantics<parallel>], iteration_bounds = array<i64: 1>, scalar_prefetch = 0 : i64, scratch_operands = 0 : i64, tpu.core_type = #tpu.core_type<tc>, window_params = [{transform_indices = @transform_0, window_bounds = array<i64: 16, 128>}, {pipeline_mode = #tpu.pipeline_mode<synchronous>, transform_indices = @transform_1, window_bounds = array<i64: 128, 128>}, {pipeline_mode = #tpu.pipeline_mode<synchronous>, transform_indices = @transform_2, window_bounds = array<i64: 1, 128>}, {pipeline_mode = #tpu.pipeline_mode<synchronous>, transform_indices = @transform_3, window_bounds = array<i64: 128, 128>}, {pipeline_mode = #tpu.pipeline_mode<synchronous>, transform_indices = @transform_4, window_bounds = array<i64: 1, 128>}, {transform_indices = @transform_5, window_bounds = array<i64: 16, 128>}]} {
    %c0 = arith.constant 0 : index
    %c0_0 = arith.constant 0 : index
    %0 = vector.load %arg1[%c0, %c0_0] : memref<16x128xf32, #tpu.memory_space<vmem>>, vector<16x128xf32>
    %c0_1 = arith.constant 0 : index
    %c0_2 = arith.constant 0 : index
    %1 = vector.load %arg2[%c0_1, %c0_2] : memref<128x128xf32, #tpu.memory_space<vmem>>, vector<128x128xf32>
    %cst = arith.constant dense<0.000000e+00> : vector<16x128xf32>
    %2 = tpu.matmul %0, %1, %cst {dimension_numbers = #tpu.dot_dimension_numbers<[1], [0], [0], [1], [0, 0, 1, 1], [], []>} : vector<16x128xf32>, vector<128x128xf32>, vector<16x128xf32> -> vector<16x128xf32>
    %c0_3 = arith.constant 0 : index
    %c0_4 = arith.constant 0 : index
    %3 = vector.load %arg3[%c0_3, %c0_4] : memref<1x128xf32, #tpu.memory_space<vmem>>, vector<1x128xf32>
    %4 = vector.broadcast %3 : vector<1x128xf32> to vector<16x128xf32>
    %5 = arith.addf %2, %4 : vector<16x128xf32>
    %cst_5 = arith.constant 0.000000e+00 : f32
    %6 = vector.broadcast %cst_5 : f32 to vector<16x128xf32>
    %7 = arith.maximumf %5, %6 : vector<16x128xf32>
    %c0_6 = arith.constant 0 : index
    %c0_7 = arith.constant 0 : index
    %8 = vector.load %arg4[%c0_6, %c0_7] : memref<128x128xf32, #tpu.memory_space<vmem>>, vector<128x128xf32>
    %cst_8 = arith.constant dense<0.000000e+00> : vector<16x128xf32>
    %9 = tpu.matmul %7, %8, %cst_8 {dimension_numbers = #tpu.dot_dimension_numbers<[1], [0], [0], [1], [0, 0, 1, 1], [], []>} : vector<16x128xf32>, vector<128x128xf32>, vector<16x128xf32> -> vector<16x128xf32>
    %c0_9 = arith.constant 0 : index
    %c0_10 = arith.constant 0 : index
    %10 = vector.load %arg5[%c0_9, %c0_10] : memref<1x128xf32, #tpu.memory_space<vmem>>, vector<1x128xf32>
    %11 = vector.broadcast %10 : vector<1x128xf32> to vector<16x128xf32>
    %12 = arith.addf %9, %11 : vector<16x128xf32>
    %c0_11 = arith.constant 0 : index
    %c0_12 = arith.constant 0 : index
    %13 = vector.load %arg6[%c0_11, %c0_12] : memref<16x128xf32, #tpu.memory_space<vmem>>, vector<16x128xf32>
    tpu.vector_store %arg6[%c0_11, %c0_12], %12 {strides = array<i32>} : memref<16x128xf32, #tpu.memory_space<vmem>>, vector<16x128xf32>,
    return
  }
  func.func @transform_0(%arg0: i32) -> (i32, i32) {
    %c0_i32 = arith.constant 0 : i32
    %c0_i32_0 = arith.constant 0 : i32
    return %arg0, %c0_i32 : i32, i32
  }
  func.func @transform_1(%arg0: i32) -> (i32, i32) {
    %c0_i32 = arith.constant 0 : i32
    %c0_i32_0 = arith.constant 0 : i32
    %c0_i32_1 = arith.constant 0 : i32
    return %c0_i32, %c0_i32_0 : i32, i32
  }
  func.func @transform_2(%arg0: i32) -> (i32, i32) {
    %c0_i32 = arith.constant 0 : i32
    %c0_i32_0 = arith.constant 0 : i32
    %c0_i32_1 = arith.constant 0 : i32
    return %c0_i32, %c0_i32_0 : i32, i32
  }
  func.func @transform_3(%arg0: i32) -> (i32, i32) {
    %c0_i32 = arith.constant 0 : i32
    %c0_i32_0 = arith.constant 0 : i32
    %c0_i32_1 = arith.constant 0 : i32
    return %c0_i32, %c0_i32_0 : i32, i32
  }
  func.func @transform_4(%arg0: i32) -> (i32, i32) {
    %c0_i32 = arith.constant 0 : i32
    %c0_i32_0 = arith.constant 0 : i32
    %c0_i32_1 = arith.constant 0 : i32
    return %c0_i32, %c0_i32_0 : i32, i32
  }
  func.func @transform_5(%arg0: i32) -> (i32, i32) {
    %c0_i32 = arith.constant 0 : i32
    %c0_i32_0 = arith.constant 0 : i32
    return %arg0, %c0_i32 : i32, i32
  }
}

</mosaic_0001>

<bundles_post_ra>
// kernel: tpu_custom_call.1
= control target key start
LH: loop header
LB: loop body
LE: loop exit
PB: predicated region body
PF: predicated region fallthrough
CT: control target
= control target key end

     0   :  { %10 = vsyncpa [#allocation3], 0  ;;  %s388_s0 = inlined_call_operand.hbm [shape: f32[16,128], index: 0, kind: input, shape index: {}]   ;;  %s389_s1 = inlined_call_operand.hbm [shape: f32[128,128], index: 1, kind: input, shape index: {}]   ;;  %s390_s2 = inlined_call_operand.vmem [shape: f32[1,128], index: 2, kind: input, shape index: {}]   ;;  %s391_s3 = inlined_call_operand.hbm [shape: f32[128,128], index: 3, kind: input, shape index: {}]   ;;  %s392_s4 = inlined_call_operand.vmem [shape: f32[1,128], index: 4, kind: input, shape index: {}]   ;;  %s393_s5 = inlined_call_operand.hbm [shape: f32[16,128], index: 5, kind: output, shape index: {}]  }
   0x1   :  { %11 = vsyncpa [#allocation6], 0 }
   0x2   :  { %12 = vsyncpa [#allocation4], 0  ;;  %s30_s20 = sshll.u32 %s389_s1, 4  ;;  %s322_s21 = smov [#allocation5]   ;;  %s31_s20 = int_to_ptr.hbm [resolvable:$true] %s30_s20 }
   0x3   :  { %s32_s22 = sshll.u32 %s322_s21, 4  ;;  %s17_s25 = sshll.u32 %s388_s0, 4  ;;  %s33_s22 = int_to_ptr.vmem [resolvable:$true] %s32_s22  ;;  %s18_s25 = int_to_ptr.hbm [resolvable:$true] %s17_s25 }
   0x4   :  { %s323_s26 = smov 128   ;;  %s324_s27 = smov 8  }
   0x5   :  { %38 = dma.hbm_to_vmem [thread:$0]  %s31_s20, 2048, %s33_s22, [#allocation6], %s323_s26, %s323_s26, %s324_s27  }
   0x6   :  { %s325_s28 = smov [#allocation2]   ;;  %s45_s1 = sshll.u32 %s391_s3, 4  ;;  %s46_s1 = int_to_ptr.hbm [resolvable:$true] %s45_s1 }
   0x7   :  { %s19_s29 = sshll.u32 %s325_s28, 4  ;;  %s326_s0 = smov [#allocation7]   ;;  %s20_s29 = int_to_ptr.vmem [resolvable:$true] %s19_s29 }
   0x8   :  { %25 = dma.hbm_to_vmem [thread:$0]  %s18_s25, 256, %s20_s29, [#allocation3], %s323_s26, %s323_s26, %s324_s27  }
   0x9   :  { %s47_s7 = sshll.u32 %s326_s0, 4  ;;  %s48_s7 = int_to_ptr.vmem [resolvable:$true] %s47_s7 }
   0xa   :  { %53 = dma.hbm_to_vmem [thread:$0]  %s46_s1, 2048, %s48_s7, [#allocation6], %s323_s26, %s323_s26, %s324_s27  }
   0xb   :  { %316 = dma.done.wait [#allocation3], 256  }
   0xc   :  { %317 = vsyncadd [#allocation3], 4294967040 }
   0xd   :  { %318 = dma.done.wait [#allocation6], 4096  }
   0xe   :  { %319 = vsyncadd [#allocation6], 4294963200  ;;  %v85_v0 = vld [vmem:[#allocation5 + $0x78] sm:$0xff]  ;;  %v84_v1 = vld [vmem:[#allocation5 + $0x70] sm:$0xff]  ;;  %s327_s11 = smov [#allocation8]  }
   0xf   :  { %180 = vmatpush.msra.mxu2 %v85_v0  ;;  %90 = vmatpush.msra.mxu0 %v85_v0  ;;  %v83_v2 = vld [vmem:[#allocation5 + $0x68] sm:$0xff]  ;;  %v82_v3 = vld [vmem:[#allocation5 + $0x60] sm:$0xff]  ;;  %v81_v4 = vld [vmem:[#allocation5 + $0x58] sm:$0xff]  ;;  %s164_s12 = sshll.u32 %s327_s11, 4  ;;  %s165_s12 = int_to_ptr.vmem [resolvable:$true] %s164_s12 }
  0x10   :  { %v130_v5 = vld [vmem:[#allocation7 + $0x78] sm:$0xff]  ;;  %v129_v6 = vld [vmem:[#allocation7 + $0x70] sm:$0xff]  ;;  %v128_v8 = vld [vmem:[#allocation7 + $0x68] sm:$0xff] }
  0x11   :  { %181 = vmatpush.msra.mxu2 %v84_v1  ;;  %91 = vmatpush.msra.mxu0 %v84_v1  ;;  %v80_v7 = vld [vmem:[#allocation5 + $0x50] sm:$0xff]  ;;  %v79_v9 = vld [vmem:[#allocation5 + $0x48] sm:$0xff]  ;;  %v127_v10 = vld [vmem:[#allocation7 + $0x60] sm:$0xff] }
  0x12   :  { %196 = vmatpush.msra.mxu3 %v130_v5  ;;  %135 = vmatpush.msra.mxu1 %v130_v5  ;;  %v78_v11 = vld [vmem:[#allocation5 + $0x40] sm:$0xff]  ;;  %v126_v12 = vld [vmem:[#allocation7 + $0x58] sm:$0xff]  ;;  %v125_v14 = vld [vmem:[#allocation7 + $0x50] sm:$0xff] }
  0x13   :  { %182 = vmatpush.msra.mxu2 %v83_v2  ;;  %92 = vmatpush.msra.mxu0 %v83_v2  ;;  %v77_v13 = vld [vmem:[#allocation5 + $0x38] sm:$0xff]  ;;  %v76_v15 = vld [vmem:[#allocation5 + $0x30] sm:$0xff]  ;;  %v124_v16 = vld [vmem:[#allocation7 + $0x48] sm:$0xff] }
  0x14   :  { %197 = vmatpush.msra.mxu3 %v129_v6  ;;  %136 = vmatpush.msra.mxu1 %v129_v6  ;;  %v75_v17 = vld [vmem:[#allocation5 + $0x28] sm:$0xff]  ;;  %v123_v18 = vld [vmem:[#allocation7 + $0x40] sm:$0xff]  ;;  %v122_v20 = vld [vmem:[#allocation7 + $0x38] sm:$0xff] }
  0x15   :  { %183 = vmatpush.msra.mxu2 %v82_v3  ;;  %93 = vmatpush.msra.mxu0 %v82_v3  ;;  %v74_v19 = vld [vmem:[#allocation5 + $0x20] sm:$0xff]  ;;  %v73_v21 = vld [vmem:[#allocation5 + $0x18] sm:$0xff]  ;;  %v121_v22 = vld [vmem:[#allocation7 + $0x30] sm:$0xff] }
  0x16   :  { %198 = vmatpush.msra.mxu3 %v128_v8  ;;  %137 = vmatpush.msra.mxu1 %v128_v8  ;;  %v72_v23 = vld [vmem:[#allocation5 + $0x10] sm:$0xff]  ;;  %v120_v24 = vld [vmem:[#allocation7 + $0x28] sm:$0xff]  ;;  %v119_v26 = vld [vmem:[#allocation7 + $0x20] sm:$0xff] }
  0x17   :  { %184 = vmatpush.msra.mxu2 %v81_v4  ;;  %94 = vmatpush.msra.mxu0 %v81_v4  ;;  %v71_v25 = vld [vmem:[#allocation5 + $0x8] sm:$0xff]  ;;  %v70_v27 = vld [vmem:[#allocation5] sm:$0xff]  ;;  %v69_v28 = vld [vmem:[#allocation2 + $0x8] sm:$0xff] }
  0x18   :  { %199 = vmatpush.msra.mxu3 %v127_v10  ;;  %138 = vmatpush.msra.mxu1 %v127_v10  ;;  %v68_v29 = vld [vmem:[#allocation2] sm:$0xff]  ;;  %v118_v30 = vld [vmem:[#allocation7 + $0x18] sm:$0xff]  ;;  %v116_v32 = vld [vmem:[#allocation7 + $0x8] sm:$0xff] }
  0x19   :  { %185 = vmatpush.msra.mxu2 %v80_v7  ;;  %95 = vmatpush.msra.mxu0 %v80_v7  ;;  %v117_v31 = vld [vmem:[#allocation7 + $0x10] sm:$0xff]  ;;  %v115_v33 = vld [vmem:[#allocation7] sm:$0xff] }
  0x1a   :  { %200 = vmatpush.msra.mxu3 %v126_v12  ;;  %139 = vmatpush.msra.mxu1 %v126_v12  ;;  %v218_v34 = vld [vmem:[%s390_s2] ss:$0 sm:$0xff]  ;;  %s166_s2 = sshll.u32 %s393_s5, 4  ;;  %s167_s2 = int_to_ptr.hbm [resolvable:$true] %s166_s2 }
  0x1b   :  { %186 = vmatpush.msra.mxu2 %v79_v9  ;;  %96 = vmatpush.msra.mxu0 %v79_v9  ;;  %v219_v41 = vld [vmem:[%s392_s4] ss:$0 sm:$0xff] }
  0x1c   :  { %201 = vmatpush.msra.mxu3 %v125_v14  ;;  %140 = vmatpush.msra.mxu1 %v125_v14 }
  0x1d   :  { %187 = vmatpush.msra.mxu2 %v78_v11  ;;  %97 = vmatpush.msra.mxu0 %v78_v11 }
  0x1e   :  { %202 = vmatpush.msra.mxu3 %v124_v16  ;;  %141 = vmatpush.msra.mxu1 %v124_v16 }
  0x1f   :  { %188 = vmatpush.msra.mxu2 %v77_v13  ;;  %98 = vmatpush.msra.mxu0 %v77_v13 }
  0x20   :  { %203 = vmatpush.msra.mxu3 %v123_v18  ;;  %142 = vmatpush.msra.mxu1 %v123_v18 }
  0x21   :  { %189 = vmatpush.msra.mxu2 %v76_v15  ;;  %99 = vmatpush.msra.mxu0 %v76_v15 }
  0x22   :  { %204 = vmatpush.msra.mxu3 %v122_v20  ;;  %143 = vmatpush.msra.mxu1 %v122_v20 }
  0x23   :  { %190 = vmatpush.msra.mxu2 %v75_v17  ;;  %100 = vmatpush.msra.mxu0 %v75_v17 }
  0x24   :  { %205 = vmatpush.msra.mxu3 %v121_v22  ;;  %144 = vmatpush.msra.mxu1 %v121_v22 }
  0x25   :  { %191 = vmatpush.msra.mxu2 %v74_v19  ;;  %101 = vmatpush.msra.mxu0 %v74_v19 }
  0x26   :  { %206 = vmatpush.msra.mxu3 %v120_v24  ;;  %145 = vmatpush.msra.mxu1 %v120_v24 }
  0x27   :  { %192 = vmatpush.msra.mxu2 %v73_v21  ;;  %102 = vmatpush.msra.mxu0 %v73_v21 }
  0x28   :  { %207 = vmatpush.msra.mxu3 %v119_v26  ;;  %146 = vmatpush.msra.mxu1 %v119_v26 }
  0x29   :  { %193 = vmatpush.msra.mxu2 %v72_v23  ;;  %103 = vmatpush.msra.mxu0 %v72_v23 }
  0x2a   :  { %208 = vmatpush.msra.mxu3 %v118_v30  ;;  %147 = vmatpush.msra.mxu1 %v118_v30 }
  0x2b   :  { %194 = vmatpush.msra.mxu2 %v71_v25  ;;  %104 = vmatpush.msra.mxu0 %v71_v25 }
  0x2c   :  { %209 = vmatpush.msra.mxu3 %v117_v31  ;;  %148 = vmatpush.msra.mxu1 %v117_v31 }
  0x2d   :  { %195 = vmatpush.msra.mxu2 %v70_v27  ;;  %105 = vmatpush.msra.mxu0 %v70_v27 }
  0x2e   :  { %109 = vmatmul.f32.vlgmr.msra.gmra.mxu2 %v69_v28  ;;  %106 = vmatmul.f32.vlgmr.msra.gmra.mxu0 %v68_v29 }
  0x2f   :  { %210 = vmatpush.msra.mxu3 %v116_v32  ;;  %149 = vmatpush.msra.mxu1 %v116_v32 }
  0x31   :  { %211 = vmatpush.msra.mxu3 %v115_v33  ;;  %150 = vmatpush.msra.mxu1 %v115_v33 }
  0xab   :  { %v107_v35 = vpop.f32.mrf.mxu0 }
  0xac   :  { %v108_v36 = vadd.f32 %v218_v34, %v107_v35 }
  0xae   :  { %v113_v37 = vmax.f32 %v108_v36, 0.0 }
  0xb0   :  { %151 = vmatmul.f32.vlgmr.msra.gmra.mxu1 %v113_v37 }
  0xb1   :  { %v110_v38 = vpop.f32.mrf.mxu2 }
  0xb2   :  { %v111_v39 = vadd.f32 %v218_v34, %v110_v38 }
  0xb4   :  { %v114_v40 = vmax.f32 %v111_v39, 0.0 }
  0xb6   :  { %154 = vmatmul.f32.vlgmr.msra.gmra.mxu3 %v114_v40 }
 0x12d   :  { %v152_v42 = vpop.f32.mrf.mxu1 }
 0x12e   :  { %v153_v43 = vadd.f32 %v219_v41, %v152_v42 }
 0x130   :  { %158 = vst [vmem:[#allocation8] sm:$0xff] %v153_v43 }
 0x139   :  { %v155_v44 = vpop.f32.mrf.mxu3 }
 0x13a   :  { %v156_v45 = vadd.f32 %v219_v41, %v155_v44 }
 0x13c   :  { %159 = vst [vmem:[#allocation8 + $0x8] sm:$0xff] %v156_v45 }
 0x13d   :  { %172 = dma.vmem_to_hbm [thread:$0]  %s165_s12, 256, %s167_s2, [#allocation4], %s323_s26, %s323_s26, %s324_s27  }
 0x13e   :  { %320 = dma.done.wait [#allocation4], 256  }
 0x13f   :  { %321 = vsyncadd [#allocation4], 4294967040 }
 0x140   :  { %177 = vsyncpa [#allocation3], 1 }
 0x141   :  { %178 = vsyncpa [#allocation6], 1 }
 0x142   :  { %179 = vsyncpa [#allocation4], 1 }

// kernel: tpu_custom_call.1
= control target key start
LH: loop header
LB: loop body
LE: loop exit
PB: predicated region body
PF: predicated region fallthrough
CT: control target
= control target key end

     0   :  { %10 = vsyncpa [#allocation3], 0  ;;  %s388_s0 = inlined_call_operand.hbm [shape: f32[16,128], index: 0, kind: input, shape index: {}]   ;;  %s389_s1 = inlined_call_operand.hbm [shape: f32[128,128], index: 1, kind: input, shape index: {}]   ;;  %s390_s2 = inlined_call_operand.vmem [shape: f32[1,128], index: 2, kind: input, shape index: {}]   ;;  %s391_s3 = inlined_call_operand.hbm [shape: f32[128,128], index: 3, kind: input, shape index: {}]   ;;  %s392_s4 = inlined_call_operand.vmem [shape: f32[1,128], index: 4, kind: input, shape index: {}]   ;;  %s393_s5 = inlined_call_operand.hbm [shape: f32[16,128], index: 5, kind: output, shape index: {}]  }
   0x1   :  { %11 = vsyncpa [#allocation6], 0 }
   0x2   :  { %12 = vsyncpa [#allocation4], 0  ;;  %s30_s20 = sshll.u32 %s389_s1, 4  ;;  %s322_s21 = smov [#allocation5]   ;;  %s31_s20 = int_to_ptr.hbm [resolvable:$true] %s30_s20 }
   0x3   :  { %s32_s22 = sshll.u32 %s322_s21, 4  ;;  %s17_s25 = sshll.u32 %s388_s0, 4  ;;  %s33_s22 = int_to_ptr.vmem [resolvable:$true] %s32_s22  ;;  %s18_s25 = int_to_ptr.hbm [resolvable:$true] %s17_s25 }
   0x4   :  { %s323_s26 = smov 128   ;;  %s324_s27 = smov 8  }
   0x5   :  { %38 = dma.hbm_to_vmem [thread:$0]  %s31_s20, 2048, %s33_s22, [#allocation6], %s323_s26, %s323_s26, %s324_s27  }
   0x6   :  { %s325_s28 = smov [#allocation2]   ;;  %s45_s1 = sshll.u32 %s391_s3, 4  ;;  %s46_s1 = int_to_ptr.hbm [resolvable:$true] %s45_s1 }
   0x7   :  { %s19_s29 = sshll.u32 %s325_s28, 4  ;;  %s326_s0 = smov [#allocation7]   ;;  %s20_s29 = int_to_ptr.vmem [resolvable:$true] %s19_s29 }
   0x8   :  { %25 = dma.hbm_to_vmem [thread:$0]  %s18_s25, 256, %s20_s29, [#allocation3], %s323_s26, %s323_s26, %s324_s27  }
   0x9   :  { %s47_s7 = sshll.u32 %s326_s0, 4  ;;  %s48_s7 = int_to_ptr.vmem [resolvable:$true] %s47_s7 }
   0xa   :  { %53 = dma.hbm_to_vmem [thread:$0]  %s46_s1, 2048, %s48_s7, [#allocation6], %s323_s26, %s323_s26, %s324_s27  }
   0xb   :  { %316 = dma.done.wait [#allocation3], 256  }
   0xc   :  { %317 = vsyncadd [#allocation3], 4294967040 }
   0xd   :  { %318 = dma.done.wait [#allocation6], 4096  }
   0xe   :  { %319 = vsyncadd [#allocation6], 4294963200  ;;  %v85_v0 = vld [vmem:[#allocation5 + $0x78] sm:$0xff]  ;;  %v84_v1 = vld [vmem:[#allocation5 + $0x70] sm:$0xff]  ;;  %s327_s11 = smov [#allocation8]  }
   0xf   :  { %180 = vmatpush.msra.mxu2 %v85_v0  ;;  %90 = vmatpush.msra.mxu0 %v85_v0  ;;  %v83_v2 = vld [vmem:[#allocation5 + $0x68] sm:$0xff]  ;;  %v82_v3 = vld [vmem:[#allocation5 + $0x60] sm:$0xff]  ;;  %v81_v4 = vld [vmem:[#allocation5 + $0x58] sm:$0xff]  ;;  %s164_s12 = sshll.u32 %s327_s11, 4  ;;  %s165_s12 = int_to_ptr.vmem [resolvable:$true] %s164_s12 }
  0x10   :  { %v130_v5 = vld [vmem:[#allocation7 + $0x78] sm:$0xff]  ;;  %v129_v6 = vld [vmem:[#allocation7 + $0x70] sm:$0xff]  ;;  %v128_v8 = vld [vmem:[#allocation7 + $0x68] sm:$0xff] }
  0x11   :  { %181 = vmatpush.msra.mxu2 %v84_v1  ;;  %91 = vmatpush.msra.mxu0 %v84_v1  ;;  %v80_v7 = vld [vmem:[#allocation5 + $0x50] sm:$0xff]  ;;  %v79_v9 = vld [vmem:[#allocation5 + $0x48] sm:$0xff]  ;;  %v127_v10 = vld [vmem:[#allocation7 + $0x60] sm:$0xff] }
  0x12   :  { %196 = vmatpush.msra.mxu3 %v130_v5  ;;  %135 = vmatpush.msra.mxu1 %v130_v5  ;;  %v78_v11 = vld [vmem:[#allocation5 + $0x40] sm:$0xff]  ;;  %v126_v12 = vld [vmem:[#allocation7 + $0x58] sm:$0xff]  ;;  %v125_v14 = vld [vmem:[#allocation7 + $0x50] sm:$0xff] }
  0x13   :  { %182 = vmatpush.msra.mxu2 %v83_v2  ;;  %92 = vmatpush.msra.mxu0 %v83_v2  ;;  %v77_v13 = vld [vmem:[#allocation5 + $0x38] sm:$0xff]  ;;  %v76_v15 = vld [vmem:[#allocation5 + $0x30] sm:$0xff]  ;;  %v124_v16 = vld [vmem:[#allocation7 + $0x48] sm:$0xff] }
  0x14   :  { %197 = vmatpush.msra.mxu3 %v129_v6  ;;  %136 = vmatpush.msra.mxu1 %v129_v6  ;;  %v75_v17 = vld [vmem:[#allocation5 + $0x28] sm:$0xff]  ;;  %v123_v18 = vld [vmem:[#allocation7 + $0x40] sm:$0xff]  ;;  %v122_v20 = vld [vmem:[#allocation7 + $0x38] sm:$0xff] }
  0x15   :  { %183 = vmatpush.msra.mxu2 %v82_v3  ;;  %93 = vmatpush.msra.mxu0 %v82_v3  ;;  %v74_v19 = vld [vmem:[#allocation5 + $0x20] sm:$0xff]  ;;  %v73_v21 = vld [vmem:[#allocation5 + $0x18] sm:$0xff]  ;;  %v121_v22 = vld [vmem:[#allocation7 + $0x30] sm:$0xff] }
  0x16   :  { %198 = vmatpush.msra.mxu3 %v128_v8  ;;  %137 = vmatpush.msra.mxu1 %v128_v8  ;;  %v72_v23 = vld [vmem:[#allocation5 + $0x10] sm:$0xff]  ;;  %v120_v24 = vld [vmem:[#allocation7 + $0x28] sm:$0xff]  ;;  %v119_v26 = vld [vmem:[#allocation7 + $0x20] sm:$0xff] }
  0x17   :  { %184 = vmatpush.msra.mxu2 %v81_v4  ;;  %94 = vmatpush.msra.mxu0 %v81_v4  ;;  %v71_v25 = vld [vmem:[#allocation5 + $0x8] sm:$0xff]  ;;  %v70_v27 = vld [vmem:[#allocation5] sm:$0xff]  ;;  %v69_v28 = vld [vmem:[#allocation2 + $0x8] sm:$0xff] }
  0x18   :  { %199 = vmatpush.msra.mxu3 %v127_v10  ;;  %138 = vmatpush.msra.mxu1 %v127_v10  ;;  %v68_v29 = vld [vmem:[#allocation2] sm:$0xff]  ;;  %v118_v30 = vld [vmem:[#allocation7 + $0x18] sm:$0xff]  ;;  %v116_v32 = vld [vmem:[#allocation7 + $0x8] sm:$0xff] }
  0x19   :  { %185 = vmatpush.msra.mxu2 %v80_v7  ;;  %95 = vmatpush.msra.mxu0 %v80_v7  ;;  %v117_v31 = vld [vmem:[#allocation7 + $0x10] sm:$0xff]  ;;  %v115_v33 = vld [vmem:[#allocation7] sm:$0xff] }
  0x1a   :  { %200 = vmatpush.msra.mxu3 %v126_v12  ;;  %139 = vmatpush.msra.mxu1 %v126_v12  ;;  %v218_v34 = vld [vmem:[%s390_s2] ss:$0 sm:$0xff]  ;;  %s166_s2 = sshll.u32 %s393_s5, 4  ;;  %s167_s2 = int_to_ptr.hbm [resolvable:$true] %s166_s2 }
  0x1b   :  { %186 = vmatpush.msra.mxu2 %v79_v9  ;;  %96 = vmatpush.msra.mxu0 %v79_v9  ;;  %v219_v41 = vld [vmem:[%s392_s4] ss:$0 sm:$0xff] }
  0x1c   :  { %201 = vmatpush.msra.mxu3 %v125_v14  ;;  %140 = vmatpush.msra.mxu1 %v125_v14 }
  0x1d   :  { %187 = vmatpush.msra.mxu2 %v78_v11  ;;  %97 = vmatpush.msra.mxu0 %v78_v11 }
  0x1e   :  { %202 = vmatpush.msra.mxu3 %v124_v16  ;;  %141 = vmatpush.msra.mxu1 %v124_v16 }
  0x1f   :  { %188 = vmatpush.msra.mxu2 %v77_v13  ;;  %98 = vmatpush.msra.mxu0 %v77_v13 }
  0x20   :  { %203 = vmatpush.msra.mxu3 %v123_v18  ;;  %142 = vmatpush.msra.mxu1 %v123_v18 }
  0x21   :  { %189 = vmatpush.msra.mxu2 %v76_v15  ;;  %99 = vmatpush.msra.mxu0 %v76_v15 }
  0x22   :  { %204 = vmatpush.msra.mxu3 %v122_v20  ;;  %143 = vmatpush.msra.mxu1 %v122_v20 }
  0x23   :  { %190 = vmatpush.msra.mxu2 %v75_v17  ;;  %100 = vmatpush.msra.mxu0 %v75_v17 }
  0x24   :  { %205 = vmatpush.msra.mxu3 %v121_v22  ;;  %144 = vmatpush.msra.mxu1 %v121_v22 }
  0x25   :  { %191 = vmatpush.msra.mxu2 %v74_v19  ;;  %101 = vmatpush.msra.mxu0 %v74_v19 }
  0x26   :  { %206 = vmatpush.msra.mxu3 %v120_v24  ;;  %145 = vmatpush.msra.mxu1 %v120_v24 }
  0x27   :  { %192 = vmatpush.msra.mxu2 %v73_v21  ;;  %102 = vmatpush.msra.mxu0 %v73_v21 }
  0x28   :  { %207 = vmatpush.msra.mxu3 %v119_v26  ;;  %146 = vmatpush.msra.mxu1 %v119_v26 }
  0x29   :  { %193 = vmatpush.msra.mxu2 %v72_v23  ;;  %103 = vmatpush.msra.mxu0 %v72_v23 }
  0x2a   :  { %208 = vmatpush.msra.mxu3 %v118_v30  ;;  %147 = vmatpush.msra.mxu1 %v118_v30 }
  0x2b   :  { %194 = vmatpush.msra.mxu2 %v71_v25  ;;  %104 = vmatpush.msra.mxu0 %v71_v25 }
  0x2c   :  { %209 = vmatpush.msra.mxu3 %v117_v31  ;;  %148 = vmatpush.msra.mxu1 %v117_v31 }
  0x2d   :  { %195 = vmatpush.msra.mxu2 %v70_v27  ;;  %105 = vmatpush.msra.mxu0 %v70_v27 }
  0x2e   :  { %109 = vmatmul.f32.vlgmr.msra.gmra.mxu2 %v69_v28  ;;  %106 = vmatmul.f32.vlgmr.msra.gmra.mxu0 %v68_v29 }
  0x2f   :  { %210 = vmatpush.msra.mxu3 %v116_v32  ;;  %149 = vmatpush.msra.mxu1 %v116_v32 }
  0x31   :  { %211 = vmatpush.msra.mxu3 %v115_v33  ;;  %150 = vmatpush.msra.mxu1 %v115_v33 }
  0xab   :  { %v107_v35 = vpop.f32.mrf.mxu0 }
  0xac   :  { %v108_v36 = vadd.f32 %v218_v34, %v107_v35 }
  0xae   :  { %v113_v37 = vmax.f32 %v108_v36, 0.0 }
  0xb0   :  { %151 = vmatmul.f32.vlgmr.msra.gmra.mxu1 %v113_v37 }
  0xb1   :  { %v110_v38 = vpop.f32.mrf.mxu2 }
  0xb2   :  { %v111_v39 = vadd.f32 %v218_v34, %v110_v38 }
  0xb4   :  { %v114_v40 = vmax.f32 %v111_v39, 0.0 }
  0xb6   :  { %154 = vmatmul.f32.vlgmr.msra.gmra.mxu3 %v114_v40 }
 0x12d   :  { %v152_v42 = vpop.f32.mrf.mxu1 }
 0x12e   :  { %v153_v43 = vadd.f32 %v219_v41, %v152_v42 }
 0x130   :  { %158 = vst [vmem:[#allocation8] sm:$0xff] %v153_v43 }
 0x139   :  { %v155_v44 = vpop.f32.mrf.mxu3 }
 0x13a   :  { %v156_v45 = vadd.f32 %v219_v41, %v155_v44 }
 0x13c   :  { %159 = vst [vmem:[#allocation8 + $0x8] sm:$0xff] %v156_v45 }
 0x13d   :  { %172 = dma.vmem_to_hbm [thread:$0]  %s165_s12, 256, %s167_s2, [#allocation4], %s323_s26, %s323_s26, %s324_s27  }
 0x13e   :  { %320 = dma.done.wait [#allocation4], 256  }
 0x13f   :  { %321 = vsyncadd [#allocation4], 4294967040 }
 0x140   :  { %177 = vsyncpa [#allocation3], 1 }
 0x141   :  { %178 = vsyncpa [#allocation6], 1 }
 0x142   :  { %179 = vsyncpa [#allocation4], 1 }

</bundles_post_ra>
